<compile_context>
chip_gen: v7x
topology: tpu7x:2x2x1
jax: 0.10.0
libtpu: 0.0.40
codegen_flags: <defaults>
</compile_context>

<pallas_src>
import functools

import jax
import jax.numpy as jnp
from jax.experimental import pallas as pl
from jax.experimental.pallas import tpu as pltpu


EPS = 1e-5
NEG_SLOPE = 0.2


def _round_up(x, m):
    return -(-x // m) * m


def _vmem_limit_bytes():
    """Generation-aware scoped-VMEM budget (128 MiB on v5e/v6e, 64 MiB on v7x)."""
    try:
        cap = int(pltpu.get_tpu_info().vmem_capacity_bytes)
    except Exception:  # conservative fallback if the query is unavailable
        cap = 64 * 1024 * 1024
    return max(32 * 1024 * 1024, min(cap * 2 // 3, 96 * 1024 * 1024))


def _pick_batch_block(n, per_image_bytes, vmem_budget_bytes):
    """Largest divisor of n that fits the VMEM budget (x2 for double buffering)
    while keeping >= 2 grid steps so both v7x TensorCores get work."""
    cap = max(1, min(8, vmem_budget_bytes // max(1, 2 * per_image_bytes)))
    best = 1
    for d in range(1, n + 1):
        if n % d == 0 and d <= cap and (n // d >= 2 or n == 1):
            best = d
    return best


def _convblock_kernel(x_ref, w_ref, aux_ref, o_ref, *, nb, tp, offsets, inv_p,
                      activation, batch_norm):
    """Fused LeakyReLU + conv (as shifted matmuls) + InstanceNorm for nb images.

    x_ref:   (nb, s*s*C, SIN)  phase-major, spatially-flattened padded input
    w_ref:   (r*r, OC, s*s*C)  per-tap matmul weights (r = kernel // stride)
    aux_ref: (1, TP) f32 valid-lane mask if batch_norm else (OC, 1) f32 bias
    o_ref:   (nb, OC, TP)      conv output on the padded output grid, flattened
    """
    oc = w_ref.shape[1]
    for b in range(nb):                     # static unroll; wrapper keeps nb small
        xt = x_ref[b]                       # (KC, SIN)
        if activation:
            # LeakyReLU fused on the VMEM tile, applied once per image.
            xt = jnp.where(xt >= 0, xt, NEG_SLOPE * xt)
        # Conv = sum over the r*r taps of W_q @ (lane-shifted input), f32 acc.
        acc = jnp.zeros((oc, tp), jnp.float32)
        for q, off in enumerate(offsets):   # static lane offsets
            acc = acc + jnp.dot(w_ref[q], xt[:, off:off + tp],
                                preferred_element_type=jnp.float32)
        if batch_norm:
            # InstanceNorm2d(affine=False): the conv bias cancels, so it is not
            # added at all.  Centered two-pass stats over valid lanes only.
            m = aux_ref[...]                                   # (1, TP)
            mean = jnp.sum(acc * m, axis=1, keepdims=True) * inv_p
            cen = (acc - mean) * m
            var = jnp.sum(cen * cen, axis=1, keepdims=True) * inv_p
            y = (acc - mean) * jax.lax.rsqrt(var + EPS)
        else:
            y = acc + aux_ref[...]                             # (OC, 1) bias
        o_ref[b] = y.astype(o_ref.dtype)


def _convblock_call(xs, w_mats, aux, *, nb, tp, offsets, valid_count, activation,
                    batch_norm, out_dtype, vmem_limit, single_buffer_consts):
    n, kc, sin = xs.shape
    nq, oc, _ = w_mats.shape
    const_kw = {"pipeline_mode": pl.Buffered(1)} if single_buffer_consts else {}
    kernel = functools.partial(
        _convblock_kernel, nb=nb, tp=tp, offsets=offsets,
        inv_p=1.0 / valid_count, activation=activation, batch_norm=batch_norm)
    return pl.pallas_call(
        kernel,
        out_shape=jax.ShapeDtypeStruct((n, oc, tp), out_dtype),
        grid_spec=pltpu.PrefetchScalarGridSpec(
            num_scalar_prefetch=0,
            grid=(n // nb,),
            in_specs=[
                # nb images per grid step; last two dims cover the full array.
                pl.BlockSpec((nb, kc, sin), lambda g: (g, 0, 0)),
                # Grid-invariant operands: single-buffer to save VMEM.
                pl.BlockSpec((nq, oc, kc), lambda g: (0, 0, 0), **const_kw),
                pl.BlockSpec(aux.shape, lambda g: (0, 0), **const_kw),
            ],
            out_specs=pl.BlockSpec((nb, oc, tp), lambda g: (g, 0, 0)),
        ),
        compiler_params=pltpu.CompilerParams(
            dimension_semantics=("parallel",),     # megacore / v7x 2-TC sharding
            vmem_limit_bytes=vmem_limit),
    )(xs, w_mats, aux)


def conv_block_forward(x, weight, bias, *, stride=2, padding=1, activation=True,
                       batch_norm=True, compute_dtype=None):
    """PyTorch-equivalent ConvBlock forward.  x: (N, C_in, H, W) NCHW."""
    n, cin, h, w = x.shape
    oc, cin_w, kh, kw = weight.shape
    if cin_w != cin or kh != kw:
        raise ValueError("unexpected weight shape")
    k, s, p = kh, stride, padding
    if k % s != 0:
        raise NotImplementedError("fused kernel assumes kernel_size % stride == 0")
    r = k // s                                   # taps per spatial dim
    oh = (h + 2 * p - k) // s + 1
    ow = (w + 2 * p - k) // s + 1

    cdt = jnp.dtype(x.dtype if compute_dtype is None else compute_dtype)

    # ---- Single XLA layout pass: zero-pad + space-to-depth + flatten (~1x). ----
    # LeakyReLU and the 4x patch replication happen inside the kernel (VMEM).
    hp = _round_up(h + 2 * p, s)
    wp = _round_up(w + 2 * p, s)
    xp = jnp.pad(x, ((0, 0), (0, 0), (p, hp - h - p), (p, wp - w - p)))
    ohp, owp = hp // s, wp // s
    kc = s * s * cin
    xs = xp.reshape(n, cin, ohp, s, owp, s)
    xs = xs.transpose(0, 3, 5, 1, 2, 4).reshape(n, kc, ohp * owp)

    # Lane-dense output tile: conv evaluated on the padded (OH, OWp) grid,
    # rounded to a multiple of 128 lanes (256 once large enough for the MXU).
    lane_align = 256 if oh * owp >= 256 else 128
    tp = _round_up(oh * owp, lane_align)
    offsets = tuple(di * owp + dj for di in range(r) for dj in range(r))
    sin = max(tp + offsets[-1], ohp * owp)
    xs = jnp.pad(xs, ((0, 0), (0, 0), (0, sin - ohp * owp))).astype(cdt)

    # Per-tap weight matrices: (OC, C, K, K) -> (r*r, OC, s*s*C), phase-major.
    w6 = weight.reshape(oc, cin, r, s, r, s)               # (o, c, di, a, dj, b)
    w_mats = w6.transpose(2, 4, 0, 3, 5, 1).reshape(r * r, oc, kc).astype(cdt)

    if batch_norm:
        # Valid-lane mask over the padded output grid.  The conv bias is dropped
        # entirely: it cancels exactly under InstanceNorm(affine=False).
        s_idx = jnp.arange(tp)
        aux = ((s_idx < oh * owp) & (s_idx % owp < ow)).astype(jnp.float32)
        aux = aux.reshape(1, tp)
    else:
        aux = bias.reshape(oc, 1).astype(jnp.float32)

    vmem_limit = _vmem_limit_bytes()
    per_image = kc * sin * cdt.itemsize + oc * tp * jnp.dtype(x.dtype).itemsize
    nb = _pick_batch_block(n, per_image, vmem_limit // 2)

    call = functools.partial(
        _convblock_call, xs, w_mats, aux, nb=nb, tp=tp, offsets=offsets,
        valid_count=oh * ow, activation=activation, batch_norm=batch_norm,
        out_dtype=x.dtype, vmem_limit=vmem_limit)
    try:
        out_full = call(single_buffer_consts=True)
    except Exception:
        # TODO(synk): some Pallas versions reject single-buffered (Buffered(1))
        # constant operands; fall back to default double buffering.
        out_full = call(single_buffer_consts=False)

    # (N, OC, TP) padded grid -> NCHW valid region (cheap slice on the small
    # output tensor; keeps every in-kernel store 128-lane dense).
    return out_full[:, :, :oh * owp].reshape(n, oc, oh, owp)[:, :, :, :ow]


def _reference_forward(x, weight, bias, *, stride=2, padding=1,
                       activation=True, batch_norm=True):
    """Pure-JAX reference matching the PyTorch module."""
    h = x
    if activation:
        h = jnp.where(h >= 0, h, NEG_SLOPE * h)
    y = jax.lax.conv_general_dilated(
        h, weight, window_strides=(stride, stride),
        padding=((padding, padding), (padding, padding)),
        dimension_numbers=("NCHW", "OIHW", "NCHW"))
    y = y + bias.reshape(1, -1, 1, 1)
    if batch_norm:
        mean = jnp.mean(y, axis=(2, 3), keepdims=True)
        var = jnp.mean((y - mean) ** 2, axis=(2, 3), keepdims=True)
        y = (y - mean) * jax.lax.rsqrt(var + EPS)
    return y


if __name__ == "__main__":
    key = jax.random.PRNGKey(0)
    k_x, k_w, k_b = jax.random.split(key, 3)

    # Small shapes consistent with the module: batch=2, C_in=4, H=W=16, C_out=8.
    N, C_IN, H, W = 2, 4, 16, 16
    C_OUT, KS = 8, 4

    x = jax.random.normal(k_x, (N, C_IN, H, W), dtype=jnp.float32)
    fan_in = C_IN * KS * KS
    bound = 1.0 / (fan_in ** 0.5)
    weight = jax.random.uniform(k_w, (C_OUT, C_IN, KS, KS),
                                minval=-bound, maxval=bound, dtype=jnp.float32)
    bias = jax.random.uniform(k_b, (C_OUT,),
                              minval=-bound, maxval=bound, dtype=jnp.float32)

    # Default path: LeakyReLU -> Conv -> InstanceNorm.
    out = jax.block_until_ready(conv_block_forward(x, weight, bias))
    ref = _reference_forward(x, weight, bias)
    assert out.shape == (N, C_OUT, H // 2, W // 2), out.shape
    assert jnp.allclose(out, ref, atol=1e-4, rtol=1e-4), \
        float(jnp.max(jnp.abs(out - ref)))

    # No-norm path exercises the bias branch.
    out2 = jax.block_until_ready(
        conv_block_forward(x, weight, bias, batch_norm=False))
    ref2 = _reference_forward(x, weight, bias, batch_norm=False)
    assert jnp.allclose(out2, ref2, atol=1e-4, rtol=1e-4), \
        float(jnp.max(jnp.abs(out2 - ref2)))

    print("KERNEL_OK")
</pallas_src>

<mosaic_0001>
module attributes {stable_mosaic.version = 11 : i64} {
  func.func @_convblock_kernel(%arg0: i32, %arg1: memref<1x16x138xf32, #tpu.memory_space<vmem>>, %arg2: memref<4x8x16xf32, #tpu.memory_space<vmem>>, %arg3: memref<1x128xf32, #tpu.memory_space<vmem>>, %arg4: memref<1x8x128xf32, #tpu.memory_space<vmem>>) attributes {dimension_semantics = [#tpu.dimension_semantics<parallel>], iteration_bounds = array<i64: 2>, scalar_prefetch = 0 : i64, scratch_operands = 0 : i64, tpu.core_type = #tpu.core_type<tc>, window_params = [{transform_indices = @transform_0, window_bounds = array<i64: 1, 16, 138>}, {pipeline_mode = #tpu.pipeline_mode<synchronous>, transform_indices = @transform_1, window_bounds = array<i64: 4, 8, 16>}, {pipeline_mode = #tpu.pipeline_mode<synchronous>, transform_indices = @transform_2, window_bounds = array<i64: 1, 128>}, {transform_indices = @transform_3, window_bounds = array<i64: 1, 8, 128>}]} {
    %c0 = arith.constant 0 : index
    %c0_0 = arith.constant 0 : index
    %c0_1 = arith.constant 0 : index
    %0 = vector.load %arg1[%c0, %c0_0, %c0_1] : memref<1x16x138xf32, #tpu.memory_space<vmem>>, vector<1x16x138xf32>
    %1 = vector.shape_cast %0 : vector<1x16x138xf32> to vector<16x138xf32>
    %cst = arith.constant 0.000000e+00 : f32
    %2 = vector.broadcast %cst : f32 to vector<16x138xf32>
    %3 = arith.cmpf oge, %1, %2 : vector<16x138xf32>
    %cst_2 = arith.constant 2.000000e-01 : f32
    %4 = vector.broadcast %cst_2 : f32 to vector<16x138xf32>
    %5 = arith.mulf %4, %1 : vector<16x138xf32>
    %6 = arith.select %3, %1, %5 : vector<16x138xi1>, vector<16x138xf32>
    %cst_3 = arith.constant 0.000000e+00 : f32
    %7 = vector.broadcast %cst_3 : f32 to vector<8x128xf32>
    %c0_4 = arith.constant 0 : index
    %c0_5 = arith.constant 0 : index
    %c0_6 = arith.constant 0 : index
    %8 = vector.load %arg2[%c0_4, %c0_5, %c0_6] : memref<4x8x16xf32, #tpu.memory_space<vmem>>, vector<1x8x16xf32>
    %9 = vector.shape_cast %8 : vector<1x8x16xf32> to vector<8x16xf32>
    %10 = vector.extract_strided_slice %6 {offsets = [0, 0], sizes = [16, 128], strides = [1, 1]} : vector<16x138xf32> to vector<16x128xf32>
    %cst_7 = arith.constant dense<0.000000e+00> : vector<8x128xf32>
    %11 = tpu.matmul %9, %10, %cst_7 {dimension_numbers = #tpu.dot_dimension_numbers<[1], [0], [0], [1], [0, 0, 1, 1], [], []>} : vector<8x16xf32>, vector<16x128xf32>, vector<8x128xf32> -> vector<8x128xf32>
    %12 = arith.addf %7, %11 : vector<8x128xf32>
    %c1 = arith.constant 1 : index
    %c0_8 = arith.constant 0 : index
    %c0_9 = arith.constant 0 : index
    %13 = vector.load %arg2[%c1, %c0_8, %c0_9] : memref<4x8x16xf32, #tpu.memory_space<vmem>>, vector<1x8x16xf32>
    %14 = vector.shape_cast %13 : vector<1x8x16xf32> to vector<8x16xf32>
    %15 = vector.extract_strided_slice %6 {offsets = [0, 1], sizes = [16, 128], strides = [1, 1]} : vector<16x138xf32> to vector<16x128xf32>
    %cst_10 = arith.constant dense<0.000000e+00> : vector<8x128xf32>
    %16 = tpu.matmul %14, %15, %cst_10 {dimension_numbers = #tpu.dot_dimension_numbers<[1], [0], [0], [1], [0, 0, 1, 1], [], []>} : vector<8x16xf32>, vector<16x128xf32>, vector<8x128xf32> -> vector<8x128xf32>
    %17 = arith.addf %12, %16 : vector<8x128xf32>
    %c2 = arith.constant 2 : index
    %c0_11 = arith.constant 0 : index
    %c0_12 = arith.constant 0 : index
    %18 = vector.load %arg2[%c2, %c0_11, %c0_12] : memref<4x8x16xf32, #tpu.memory_space<vmem>>, vector<1x8x16xf32>
    %19 = vector.shape_cast %18 : vector<1x8x16xf32> to vector<8x16xf32>
    %20 = vector.extract_strided_slice %6 {offsets = [0, 9], sizes = [16, 128], strides = [1, 1]} : vector<16x138xf32> to vector<16x128xf32>
    %cst_13 = arith.constant dense<0.000000e+00> : vector<8x128xf32>
    %21 = tpu.matmul %19, %20, %cst_13 {dimension_numbers = #tpu.dot_dimension_numbers<[1], [0], [0], [1], [0, 0, 1, 1], [], []>} : vector<8x16xf32>, vector<16x128xf32>, vector<8x128xf32> -> vector<8x128xf32>
    %22 = arith.addf %17, %21 : vector<8x128xf32>
    %c3 = arith.constant 3 : index
    %c0_14 = arith.constant 0 : index
    %c0_15 = arith.constant 0 : index
    %23 = vector.load %arg2[%c3, %c0_14, %c0_15] : memref<4x8x16xf32, #tpu.memory_space<vmem>>, vector<1x8x16xf32>
    %24 = vector.shape_cast %23 : vector<1x8x16xf32> to vector<8x16xf32>
    %25 = vector.extract_strided_slice %6 {offsets = [0, 10], sizes = [16, 128], strides = [1, 1]} : vector<16x138xf32> to vector<16x128xf32>
    %cst_16 = arith.constant dense<0.000000e+00> : vector<8x128xf32>
    %26 = tpu.matmul %24, %25, %cst_16 {dimension_numbers = #tpu.dot_dimension_numbers<[1], [0], [0], [1], [0, 0, 1, 1], [], []>} : vector<8x16xf32>, vector<16x128xf32>, vector<8x128xf32> -> vector<8x128xf32>
    %27 = arith.addf %22, %26 : vector<8x128xf32>
    %c0_17 = arith.constant 0 : index
    %c0_18 = arith.constant 0 : index
    %28 = vector.load %arg3[%c0_17, %c0_18] : memref<1x128xf32, #tpu.memory_space<vmem>>, vector<1x128xf32>
    %29 = vector.broadcast %28 : vector<1x128xf32> to vector<8x128xf32>
    %30 = arith.mulf %27, %29 : vector<8x128xf32>
    %cst_19 = arith.constant dense<0.000000e+00> : vector<8xf32>
    %31 = vector.multi_reduction <add>, %30, %cst_19 [1] : vector<8x128xf32> to vector<8xf32>
    %32 = vector.shape_cast %31 : vector<8xf32> to vector<8x1xf32>
    %cst_20 = arith.constant 1.562500e-02 : f32
    %33 = vector.broadcast %cst_20 : f32 to vector<8x1xf32>
    %34 = arith.mulf %32, %33 : vector<8x1xf32>
    %35 = vector.broadcast %34 : vector<8x1xf32> to vector<8x128xf32>
    %36 = arith.subf %27, %35 : vector<8x128xf32>
    %37 = vector.broadcast %28 : vector<1x128xf32> to vector<8x128xf32>
    %38 = arith.mulf %36, %37 : vector<8x128xf32>
    %39 = arith.mulf %38, %38 : vector<8x128xf32>
    %cst_21 = arith.constant dense<0.000000e+00> : vector<8xf32>
    %40 = vector.multi_reduction <add>, %39, %cst_21 [1] : vector<8x128xf32> to vector<8xf32>
    %41 = vector.shape_cast %40 : vector<8xf32> to vector<8x1xf32>
    %cst_22 = arith.constant 1.562500e-02 : f32
    %42 = vector.broadcast %cst_22 : f32 to vector<8x1xf32>
    %43 = arith.mulf %41, %42 : vector<8x1xf32>
    %44 = vector.broadcast %34 : vector<8x1xf32> to vector<8x128xf32>
    %45 = arith.subf %27, %44 : vector<8x128xf32>
    %cst_23 = arith.constant 9.99999974E-6 : f32
    %46 = vector.broadcast %cst_23 : f32 to vector<8x1xf32>
    %47 = arith.addf %43, %46 : vector<8x1xf32>
    %48 = math.rsqrt %47 : vector<8x1xf32>
    %49 = vector.broadcast %48 : vector<8x1xf32> to vector<8x128xf32>
    %50 = arith.mulf %45, %49 : vector<8x128xf32>
    %c0_24 = arith.constant 0 : index
    %c0_25 = arith.constant 0 : index
    %c0_26 = arith.constant 0 : index
    %51 = vector.load %arg4[%c0_24, %c0_25, %c0_26] : memref<1x8x128xf32, #tpu.memory_space<vmem>>, vector<1x8x128xf32>
    %52 = vector.shape_cast %51 : vector<1x8x128xf32> to vector<8x128xf32>
    %53 = vector.shape_cast %50 : vector<8x128xf32> to vector<1x8x128xf32>
    tpu.vector_store %arg4[%c0_24, %c0_25, %c0_26], %53 {strides = array<i32>} : memref<1x8x128xf32, #tpu.memory_space<vmem>>, vector<1x8x128xf32>,
    return
  }
  func.func @transform_0(%arg0: i32) -> (i32, i32, i32) {
    %c0_i32 = arith.constant 0 : i32
    %c0_i32_0 = arith.constant 0 : i32
    %c0_i32_1 = arith.constant 0 : i32
    return %arg0, %c0_i32, %c0_i32_0 : i32, i32, i32
  }
  func.func @transform_1(%arg0: i32) -> (i32, i32, i32) {
    %c0_i32 = arith.constant 0 : i32
    %c0_i32_0 = arith.constant 0 : i32
    %c0_i32_1 = arith.constant 0 : i32
    %c0_i32_2 = arith.constant 0 : i32
    return %c0_i32, %c0_i32_0, %c0_i32_1 : i32, i32, i32
  }
  func.func @transform_2(%arg0: i32) -> (i32, i32) {
    %c0_i32 = arith.constant 0 : i32
    %c0_i32_0 = arith.constant 0 : i32
    %c0_i32_1 = arith.constant 0 : i32
    return %c0_i32, %c0_i32_0 : i32, i32
  }
  func.func @transform_3(%arg0: i32) -> (i32, i32, i32) {
    %c0_i32 = arith.constant 0 : i32
    %c0_i32_0 = arith.constant 0 : i32
    %c0_i32_1 = arith.constant 0 : i32
    return %arg0, %c0_i32, %c0_i32_0 : i32, i32, i32
  }
}

module attributes {stable_mosaic.version = 11 : i64} {
  func.func @_convblock_kernel(%arg0: i32, %arg1: memref<1x16x138xf32, #tpu.memory_space<vmem>>, %arg2: memref<4x8x16xf32, #tpu.memory_space<vmem>>, %arg3: memref<1x128xf32, #tpu.memory_space<vmem>>, %arg4: memref<1x8x128xf32, #tpu.memory_space<vmem>>) attributes {dimension_semantics = [#tpu.dimension_semantics<parallel>], iteration_bounds = array<i64: 2>, scalar_prefetch = 0 : i64, scratch_operands = 0 : i64, tpu.core_type = #tpu.core_type<tc>, window_params = [{transform_indices = @transform_0, window_bounds = array<i64: 1, 16, 138>}, {pipeline_mode = #tpu.pipeline_mode<synchronous>, transform_indices = @transform_1, window_bounds = array<i64: 4, 8, 16>}, {pipeline_mode = #tpu.pipeline_mode<synchronous>, transform_indices = @transform_2, window_bounds = array<i64: 1, 128>}, {transform_indices = @transform_3, window_bounds = array<i64: 1, 8, 128>}]} {
    %c0 = arith.constant 0 : index
    %c0_0 = arith.constant 0 : index
    %c0_1 = arith.constant 0 : index
    %0 = vector.load %arg1[%c0, %c0_0, %c0_1] : memref<1x16x138xf32, #tpu.memory_space<vmem>>, vector<1x16x138xf32>
    %1 = vector.shape_cast %0 : vector<1x16x138xf32> to vector<16x138xf32>
    %cst = arith.constant 0.000000e+00 : f32
    %2 = vector.broadcast %cst : f32 to vector<16x138xf32>
    %3 = arith.cmpf oge, %1, %2 : vector<16x138xf32>
    %cst_2 = arith.constant 2.000000e-01 : f32
    %4 = vector.broadcast %cst_2 : f32 to vector<16x138xf32>
    %5 = arith.mulf %4, %1 : vector<16x138xf32>
    %6 = arith.select %3, %1, %5 : vector<16x138xi1>, vector<16x138xf32>
    %cst_3 = arith.constant 0.000000e+00 : f32
    %7 = vector.broadcast %cst_3 : f32 to vector<8x128xf32>
    %c0_4 = arith.constant 0 : index
    %c0_5 = arith.constant 0 : index
    %c0_6 = arith.constant 0 : index
    %8 = vector.load %arg2[%c0_4, %c0_5, %c0_6] : memref<4x8x16xf32, #tpu.memory_space<vmem>>, vector<1x8x16xf32>
    %9 = vector.shape_cast %8 : vector<1x8x16xf32> to vector<8x16xf32>
    %10 = vector.extract_strided_slice %6 {offsets = [0, 0], sizes = [16, 128], strides = [1, 1]} : vector<16x138xf32> to vector<16x128xf32>
    %cst_7 = arith.constant dense<0.000000e+00> : vector<8x128xf32>
    %11 = tpu.matmul %9, %10, %cst_7 {dimension_numbers = #tpu.dot_dimension_numbers<[1], [0], [0], [1], [0, 0, 1, 1], [], []>} : vector<8x16xf32>, vector<16x128xf32>, vector<8x128xf32> -> vector<8x128xf32>
    %12 = arith.addf %7, %11 : vector<8x128xf32>
    %c1 = arith.constant 1 : index
    %c0_8 = arith.constant 0 : index
    %c0_9 = arith.constant 0 : index
    %13 = vector.load %arg2[%c1, %c0_8, %c0_9] : memref<4x8x16xf32, #tpu.memory_space<vmem>>, vector<1x8x16xf32>
    %14 = vector.shape_cast %13 : vector<1x8x16xf32> to vector<8x16xf32>
    %15 = vector.extract_strided_slice %6 {offsets = [0, 1], sizes = [16, 128], strides = [1, 1]} : vector<16x138xf32> to vector<16x128xf32>
    %cst_10 = arith.constant dense<0.000000e+00> : vector<8x128xf32>
    %16 = tpu.matmul %14, %15, %cst_10 {dimension_numbers = #tpu.dot_dimension_numbers<[1], [0], [0], [1], [0, 0, 1, 1], [], []>} : vector<8x16xf32>, vector<16x128xf32>, vector<8x128xf32> -> vector<8x128xf32>
    %17 = arith.addf %12, %16 : vector<8x128xf32>
    %c2 = arith.constant 2 : index
    %c0_11 = arith.constant 0 : index
    %c0_12 = arith.constant 0 : index
    %18 = vector.load %arg2[%c2, %c0_11, %c0_12] : memref<4x8x16xf32, #tpu.memory_space<vmem>>, vector<1x8x16xf32>
    %19 = vector.shape_cast %18 : vector<1x8x16xf32> to vector<8x16xf32>
    %20 = vector.extract_strided_slice %6 {offsets = [0, 9], sizes = [16, 128], strides = [1, 1]} : vector<16x138xf32> to vector<16x128xf32>
    %cst_13 = arith.constant dense<0.000000e+00> : vector<8x128xf32>
    %21 = tpu.matmul %19, %20, %cst_13 {dimension_numbers = #tpu.dot_dimension_numbers<[1], [0], [0], [1], [0, 0, 1, 1], [], []>} : vector<8x16xf32>, vector<16x128xf32>, vector<8x128xf32> -> vector<8x128xf32>
    %22 = arith.addf %17, %21 : vector<8x128xf32>
    %c3 = arith.constant 3 : index
    %c0_14 = arith.constant 0 : index
    %c0_15 = arith.constant 0 : index
    %23 = vector.load %arg2[%c3, %c0_14, %c0_15] : memref<4x8x16xf32, #tpu.memory_space<vmem>>, vector<1x8x16xf32>
    %24 = vector.shape_cast %23 : vector<1x8x16xf32> to vector<8x16xf32>
    %25 = vector.extract_strided_slice %6 {offsets = [0, 10], sizes = [16, 128], strides = [1, 1]} : vector<16x138xf32> to vector<16x128xf32>
    %cst_16 = arith.constant dense<0.000000e+00> : vector<8x128xf32>
    %26 = tpu.matmul %24, %25, %cst_16 {dimension_numbers = #tpu.dot_dimension_numbers<[1], [0], [0], [1], [0, 0, 1, 1], [], []>} : vector<8x16xf32>, vector<16x128xf32>, vector<8x128xf32> -> vector<8x128xf32>
    %27 = arith.addf %22, %26 : vector<8x128xf32>
    %c0_17 = arith.constant 0 : index
    %c0_18 = arith.constant 0 : index
    %28 = vector.load %arg3[%c0_17, %c0_18] : memref<1x128xf32, #tpu.memory_space<vmem>>, vector<1x128xf32>
    %29 = vector.broadcast %28 : vector<1x128xf32> to vector<8x128xf32>
    %30 = arith.mulf %27, %29 : vector<8x128xf32>
    %cst_19 = arith.constant dense<0.000000e+00> : vector<8xf32>
    %31 = vector.multi_reduction <add>, %30, %cst_19 [1] : vector<8x128xf32> to vector<8xf32>
    %32 = vector.shape_cast %31 : vector<8xf32> to vector<8x1xf32>
    %cst_20 = arith.constant 1.562500e-02 : f32
    %33 = vector.broadcast %cst_20 : f32 to vector<8x1xf32>
    %34 = arith.mulf %32, %33 : vector<8x1xf32>
    %35 = vector.broadcast %34 : vector<8x1xf32> to vector<8x128xf32>
    %36 = arith.subf %27, %35 : vector<8x128xf32>
    %37 = vector.broadcast %28 : vector<1x128xf32> to vector<8x128xf32>
    %38 = arith.mulf %36, %37 : vector<8x128xf32>
    %39 = arith.mulf %38, %38 : vector<8x128xf32>
    %cst_21 = arith.constant dense<0.000000e+00> : vector<8xf32>
    %40 = vector.multi_reduction <add>, %39, %cst_21 [1] : vector<8x128xf32> to vector<8xf32>
    %41 = vector.shape_cast %40 : vector<8xf32> to vector<8x1xf32>
    %cst_22 = arith.constant 1.562500e-02 : f32
    %42 = vector.broadcast %cst_22 : f32 to vector<8x1xf32>
    %43 = arith.mulf %41, %42 : vector<8x1xf32>
    %44 = vector.broadcast %34 : vector<8x1xf32> to vector<8x128xf32>
    %45 = arith.subf %27, %44 : vector<8x128xf32>
    %cst_23 = arith.constant 9.99999974E-6 : f32
    %46 = vector.broadcast %cst_23 : f32 to vector<8x1xf32>
    %47 = arith.addf %43, %46 : vector<8x1xf32>
    %48 = math.rsqrt %47 : vector<8x1xf32>
    %49 = vector.broadcast %48 : vector<8x1xf32> to vector<8x128xf32>
    %50 = arith.mulf %45, %49 : vector<8x128xf32>
    %c0_24 = arith.constant 0 : index
    %c0_25 = arith.constant 0 : index
    %c0_26 = arith.constant 0 : index
    %51 = vector.load %arg4[%c0_24, %c0_25, %c0_26] : memref<1x8x128xf32, #tpu.memory_space<vmem>>, vector<1x8x128xf32>
    %52 = vector.shape_cast %51 : vector<1x8x128xf32> to vector<8x128xf32>
    %53 = vector.shape_cast %50 : vector<8x128xf32> to vector<1x8x128xf32>
    tpu.vector_store %arg4[%c0_24, %c0_25, %c0_26], %53 {strides = array<i32>} : memref<1x8x128xf32, #tpu.memory_space<vmem>>, vector<1x8x128xf32>,
    return
  }
  func.func @transform_0(%arg0: i32) -> (i32, i32, i32) {
    %c0_i32 = arith.constant 0 : i32
    %c0_i32_0 = arith.constant 0 : i32
    %c0_i32_1 = arith.constant 0 : i32
    return %arg0, %c0_i32, %c0_i32_0 : i32, i32, i32
  }
  func.func @transform_1(%arg0: i32) -> (i32, i32, i32) {
    %c0_i32 = arith.constant 0 : i32
    %c0_i32_0 = arith.constant 0 : i32
    %c0_i32_1 = arith.constant 0 : i32
    %c0_i32_2 = arith.constant 0 : i32
    return %c0_i32, %c0_i32_0, %c0_i32_1 : i32, i32, i32
  }
  func.func @transform_2(%arg0: i32) -> (i32, i32) {
    %c0_i32 = arith.constant 0 : i32
    %c0_i32_0 = arith.constant 0 : i32
    %c0_i32_1 = arith.constant 0 : i32
    return %c0_i32, %c0_i32_0 : i32, i32
  }
  func.func @transform_3(%arg0: i32) -> (i32, i32, i32) {
    %c0_i32 = arith.constant 0 : i32
    %c0_i32_0 = arith.constant 0 : i32
    %c0_i32_1 = arith.constant 0 : i32
    return %arg0, %c0_i32, %c0_i32_0 : i32, i32, i32
  }
}

</mosaic_0001>

<bundles_post_ra>
// kernel: tpu_custom_call.1
= control target key start
LH: loop header
LB: loop body
LE: loop exit
PB: predicated region body
PF: predicated region fallthrough
CT: control target
= control target key end

     0   :  { %8 = vsyncpa [#allocation3], 0  ;;  %s1235_s0 = inlined_call_operand.hbm [shape: f32[2,16,138], index: 0, kind: input, shape index: {}]   ;;  %s1236_s1 = inlined_call_operand.hbm [shape: f32[4,8,16], index: 1, kind: input, shape index: {}]   ;;  %s1237_s2 = inlined_call_operand.vmem [shape: f32[1,128], index: 2, kind: input, shape index: {}]   ;;  %s1238_s3 = inlined_call_operand.hbm [shape: f32[2,8,128], index: 3, kind: output, shape index: {}]  }
   0x1   :  { %10 = vsyncpa [#allocation3 + $0x1], 0 }
   0x2   :  { %11 = vsyncpa [#allocation6], 0 }
   0x3   :  { %12 = vsyncpa [#allocation4], 0 }
   0x4   :  { %14 = vsyncpa [#allocation4 + $0x1], 0  ;;  %s1020_s12 = smov 0   ;;  %s1022_s13 = smov 0  }
   0x5   :  { %s1024_s14 = smov 0   ;;  %s1026_s15 = smov 0  }
   0x6 LB: > { %s1041_s16 = sadd.s32 4294967295, %s985_s15   ;;  %s680_s17 = sadd.s32 4294967294, %s985_s15   ;;  %s985_s15 = sphi %s1026_s15, %s1258_s15   ;;  %s981_s14 = sphi %s1024_s14, %s1257_s14   ;;  %s977_s13 = sphi %s1022_s13, %s1256_s13   ;;  %s973_s12 = sphi %s1020_s12, %s1255_s12  }
   0x7   : > { %p40_p0 = scmp.ne.s32.totalorder %s977_s13, %s973_s12  ;;  %p1239_p1 = scmp.eq.s32.totalorder %s1041_s16, 0 }
   0x8   : > { %p112_p3 = scmp.eq.s32.totalorder %s680_s17, 1  ;;  %p681_p5 = scmp.ge.s32.totalorder %s985_s15, 1 }
   0x9   : > { %p1050_p4 = por %p1239_p1, %p40_p0  ;;  %p119_p7 = scmp.lt.s32.totalorder %s985_s15, 3 }
   0xa   : > { %p1055_p6 = por %p112_p3, %p40_p0  ;;  %s987_s21 = smov [#allocation5]  }
   0xb   : > { %s1242_s18 = scalar_select %p1050_p4, 1, 0 }
   0xc   : > { %s1243_s19 = scalar_select %p1055_p6, 1, 0 }
   0xd   : > { %p1060_p8 = pnand %p681_p5, %p119_p7  ;;  %s131_s22 = sshll.u32 %s987_s21, 4  ;;  %s1064_s22 = int_to_ptr.vmem [resolvable:$true] %s131_s22 }
   0xe   : > { %s1076_s24 = sadd.s32 1, %s985_s15   ;;  %s27_s25 = sadd.s32 1, %s981_s14 }
   0xf   : > { %s1244_s20 = scalar_select %p1060_p8, 1, 0 }
  0x10   : > { %p766_p9 = pneg %p1060_p8  ;;  %s24_s26 = ssub.s32 %s985_s15, %s1076_s24 }
  0x11   : > { %s857_s29 = scalar_lea.hbm %s1236_s1, 512 }
  0x12   : > { %p1071_p11 = pnand %p766_p9, %p1239_p1  ;;  %p858_p12 = scmp.ne.s32.totalorder %s1236_s1, %s857_s29 }
  0x13   : > { %p864_p5 = scmp.lt.u32.totalorder %s857_s29, %s1236_s1 }
  0x14   : > { %p859_p13 = pneg %p1071_p11 }
  0x16   : > { %p860_p0 = pnand %p859_p13, %p858_p12 }
  0x18   : > { %p861_p3 = pneg %p860_p0 }
  0x1a   : > { %p866_p7 = pnand %p864_p5, %p861_p3 }
  0x1c   : > { %869 = shalt.err (!%p866_p7)
}
  0x1d   : > { %s870_s7 = scalar_lea.vmem %s1064_s22, 512  ;;  %p878_p2 = scmp.lt.s32.totalorder %s1064_s22, %s1064_s22 }
  0x1e   : > { %p871_p9 = scmp.ne.s32.totalorder %s1064_s22, %s870_s7  ;;  %p879_p6 = scmp.lt.s32.totalorder %s870_s7, %s870_s7 }
  0x20   : > { %p873_p10 = pnand %p871_p9, %p859_p13  ;;  %p880_p4 = por %p879_p6, %p878_p2 }
  0x22   : > { %p874_p1 = pneg %p873_p10 }
  0x24   : > { %p881_p8 = pnand %p880_p4, %p874_p1 }
  0x26   : > { %884 = shalt.err (!%p881_p8)
}
  0x27   : > { %s988_s8 = smov 128   ;;  %s989_s9 = smov 8  }
  0x28   : > { %769 = dma.hbm_to_vmem [thread:$0]  (!%p1071_p11), %s1236_s1, 512, %s1064_s22, [#allocation6], %s988_s8, %s988_s8, %s989_s9  }
  0x29   : > { %p25_p2 = scmp.eq.s32.totalorder %s24_s26, 0  ;;  %p34_p1 = scmp.ne.s32.totalorder %s981_s14, %s977_s13 }
  0x2a   : > { %p35_p4 = scmp.eq.s32.totalorder %s985_s15, 0  ;;  %p779_p6 = scmp.lt.s32.totalorder %s985_s15, 2 }
  0x2b   : > { %s1107_s17 = scalar_select %p25_p2, %s981_s14, %s27_s25  }
  0x2c   : > { %p36_p8 = por %p35_p4, %p34_p1  ;;  %p1246_p10 = scmp.eq.s32.totalorder %s1041_s16, 1 }
  0x2d   : > { %s148_s27 = sand.u32 1, %s981_s14   ;;  %s700_s28 = sshll.u32 %s985_s15, 9 }
  0x2e   : > { %p1111_p12 = por %p1246_p10, %p34_p1  ;;  %s684_s29 = sshll.u32 %s148_s27, 5 }
  0x2f   : > { %s1120_s4 = scalar_lea.hbm %s1235_s0, %s700_s28  ;;  %s152_s22 = scalar_lea.vmem [#allocation2], %s684_s29 }
  0x30   : > { %s159_s25 = sshll.u32 %s152_s22, 4  ;;  %p1122_p11 = pnand %p779_p6, %p36_p8  ;;  %s1126_s25 = int_to_ptr.vmem [resolvable:$true] %s159_s25 }
  0x31   : > { %s1128_s5 = scalar_lea.sflag [#allocation3], %s148_s27  ;;  %s885_s6 = scalar_lea.hbm %s1120_s4, 512 }
  0x32   : > { %p886_p13 = scmp.ne.s32.totalorder %s1120_s4, %s885_s6  ;;  %p887_p0 = pneg %p1122_p11 }
  0x33   : > { %s890_s9 = scalar_lea.hbm %s1235_s0, 1024  ;;  %p891_p7 = scmp.lt.u32.totalorder %s1120_s4, %s1235_s0 }
  0x34   : > { %p888_p3 = pnand %p887_p0, %p886_p13  ;;  %p892_p9 = scmp.lt.u32.totalorder %s890_s9, %s885_s6 }
  0x35   : > { %p894_p1 = scmp.lt.u32.totalorder %s885_s6, %s1120_s4 }
  0x36   : > { %p889_p5 = pneg %p888_p3  ;;  %p893_p2 = por %p892_p9, %p891_p7 }
  0x38   : > { %p895_p4 = por %p894_p1, %p893_p2 }
  0x3a   : > { %p896_p6 = pnand %p895_p4, %p889_p5 }
  0x3c   : > { %899 = shalt.err (!%p896_p6)
}
  0x3d   : > { %s900_s27 = scalar_lea.vmem %s1126_s25, 512  ;;  %s990_s28 = smov [#allocation2]  }
  0x3e   : > { %p901_p8 = scmp.ne.s32.totalorder %s1126_s25, %s900_s27  ;;  %s905_s29 = sshll.u32 %s990_s28, 4  ;;  %s906_s29 = int_to_ptr.vmem [resolvable:$false] %s905_s29 }
  0x3f   : > { %s907_s23 = scalar_lea.vmem %s906_s29, 1024  ;;  %p908_p3 = scmp.lt.s32.totalorder %s1126_s25, %s906_s29 }
  0x40   : > { %p903_p10 = pnand %p901_p8, %p887_p0  ;;  %p909_p7 = scmp.lt.s32.totalorder %s907_s23, %s900_s27 }
  0x42   : > { %p904_p13 = pneg %p903_p10  ;;  %p910_p9 = por %p909_p7, %p908_p3 }
  0x44   : > { %p911_p2 = pnand %p910_p9, %p904_p13 }
  0x46   : > { %914 = shalt.err (!%p911_p2)
}
  0x47   : > { %s991_s30 = smov 256   ;;  %s992_s22 = smov 16  }
  0x48   : > { %773 = dma.hbm_to_vmem [thread:$0]  (!%p1122_p11), %s1120_s4, 512, %s1126_s25, %s1128_s5, %s991_s30, %s991_s30, %s992_s22  }
  0x49   : > { %p1249_p0 = scmp.ne.s32.totalorder %s1244_s20, 0 }
  0x4a   : > { %s1159_s6 = sand.u32 (!%p1249_p0), 1, %s977_s13   ;;  %p1250_p5 = scmp.ne.s32.totalorder (!%p1249_p0), %s1242_s18, 0 }
  0x4b   : > { %171 = sbr.rel (%p1249_p0) target bundleno = 767 (0x2ff), region = 32  ;;  %s688_s7 = sshll.u32 (!%p1249_p0), %s1159_s6, 5 }
  0x4c   : > { %s174_s8 = scalar_lea.sflag (!%p1249_p0), [#allocation3], %s1159_s6  ;;  %s177_s9 = scalar_lea.vmem (!%p1249_p0), [#allocation2], %s688_s7 }
  0x52   : > { %960 = dma.done.wait (%p1250_p5), %s174_s8, 512  }
  0x53   : > { %962 = vsyncadd (%p1250_p5), %s174_s8, 4294966784  ;;  %p1251_p1 = scmp.eq.s32.totalorder %s1041_s16, 0 }
  0x55   : > { %964 = dma.done.wait (%p1251_p1), [#allocation6], 512   ;;  %p1252_p11 = pmov %p1251_p1 }
  0x56   : > { %v204_v0 = vld [vmem:[%s177_s9] sm:$0xff]  ;;  %v205_v1 = vld [vmem:[%s177_s9 + $0x8] sm:$0xff]  ;;  %v206_v2 = vld [vmem:[%s177_s9 + $0x10] sm:$0xff]  ;;  %v993_v5 = vmov 0.0|0.0   ;;  %s994_s18 = smov 119   ;;  %s995_s20 = smov 127  }
  0x57   : > { %966 = vsyncadd (%p1252_p11), [#allocation6], 4294966784  ;;  %vm208_vm0 = vcmp.ge.f32.partialorder %v204_v0, 0.0  ;;  %vm209_vm1 = vcmp.ge.f32.partialorder %v205_v1, 0.0  ;;  %v212_v3 = vmul.f32 0.2, %v204_v0  ;;  %741 = vmatprep.subr.bf16.mxu1 %v993_v5  ;;  %747 = vmatprep.subr.bf16.mxu0 %v993_v5 }
  0x58   : > { %v213_v4 = vmul.f32 0.2, %v205_v1  ;;  %v207_v6 = vld [vmem:[%s177_s9 + $0x18] sm:$0xff]  ;;  %vm210_vm2 = vcmp.ge.f32.partialorder %v206_v2, 0.0  ;;  %v214_v7 = vmul.f32 0.2, %v206_v2 }
  0x59   : > { %v216_v8 = vsel %vm208_vm0, %v204_v0, %v212_v3  ;;  %vm211_vm3 = vcmp.ge.f32.partialorder %v207_v6, 0.0  ;;  %v215_v10 = vmul.f32 0.2, %v207_v6  ;;  %vm996_vm4 = vmmov 0   ;;  %s998_s4 = smov 118   ;;  %v222_v41 = vld [vmem:[#allocation5 + $0x8] sm:$0xff] }
  0x5a   : > { %v217_v9 = vsel %vm209_vm1, %v205_v1, %v213_v4  ;;  %v218_v12 = vsel %vm210_vm2, %v206_v2, %v214_v7  ;;  %v997_v15 = vmov 0.0   ;;  %vm235_vm5 = vcmask 1039360   ;;  %v388_v42 = vld [vmem:[#allocation5 + $0x10] sm:$0xff]  ;;  %v220_v46 = vld [vmem:[#allocation5] sm:$0xff]  ;;  %v477_v47 = vld [vmem:[#allocation5 + $0x18] sm:$0xff]  ;;  %s690_s5 = sshll.u32 %s1159_s6, 3 }
  0x5b   : > { %v835_v11 = vpack.i.bf16 %v217_v9, %v216_v8  ;;  %v219_v13 = vsel %vm211_vm3, %v207_v6, %v215_v10  ;;  %717 = vmatprep.mubr.msk.f32.mxu1 %vm996_vm4, %v997_v15  ;;  %731 = vmatprep.mubr.msk.f32.mxu0 %vm996_vm4, %v997_v15  ;;  %v745_v16 = vpack.c.bf16 %v218_v12, %v216_v8  ;;  %vm397_vm6 = vcmask 973824   ;;  %v695_v50 = vld [vmem:[%s1237_s2] ss:$0 sm:$0xff]  ;;  %s697_s10 = sshll.u32 %s1041_s16, 7  ;;  %s203_s11 = scalar_lea.vmem [#allocation7], %s690_s5 }
  0x5c   : > { %v840_v14 = vpack.i.bf16 %v219_v13, %v218_v12  ;;  %vm486_vm7 = vcmask 965632   ;;  %vm240_vm8 = vcmask 130048   ;;  %s600_s27 = sshll.u32 %s203_s11, 4  ;;  %s1191_s23 = scalar_lea.hbm %s1238_s3, %s697_s10  ;;  %s1193_s27 = int_to_ptr.vmem [resolvable:$true] %s600_s27 }
  0x5d   : > { %836 = vrot.lane.b32.xlu1 %v835_v11, %s994_s18  ;;  %826 = vrot.lane.b32.xlu0 %v835_v11, %s995_s20  ;;  %s587_s30 = scalar_lea.sflag [#allocation4], %s1159_s6  ;;  %s915_s22 = scalar_lea.vmem %s1193_s27, 128 }
  0x5e   : > { %p916_p4 = scmp.ne.s32.totalorder %s1193_s27, %s915_s22  ;;  %s999_s16 = smov [#allocation7]  }
  0x5f   : > { %s919_s7 = sshll.u32 %s999_s16, 4  ;;  %s920_s7 = int_to_ptr.vmem [resolvable:$false] %s919_s7 }
  0x60   : > { %p917_p6 = pnand %p916_p4, %p1111_p12  ;;  %s921_s8 = scalar_lea.vmem %s920_s7, 256 }
  0x61   : > { %841 = vrot.lane.b32.xlu1 %v840_v14, %s994_s18  ;;  %831 = vrot.lane.b32.xlu0 %v840_v14, %s995_s20  ;;  %p922_p10 = scmp.lt.s32.totalorder %s1193_s27, %s920_s7  ;;  %p923_p13 = scmp.lt.s32.totalorder %s921_s8, %s915_s22 }
  0x62   : > { %p918_p8 = pneg %p917_p6 }
  0x63   : > { %p924_p3 = por %p923_p13, %p922_p10 }
  0x65   : > { %851 = vrot.lane.b32.xlu1 %v840_v14, %s998_s4  ;;  %846 = vrot.lane.b32.xlu0 %v835_v11, %s998_s4  ;;  %p925_p7 = pnand %p924_p3, %p918_p8 }
  0xcf   : > { %v837_v17 = vpop.permute.xlu1 %836  ;;  %v827_v18 = vpop.permute.xlu0 %826 }
  0xd0   : > { %v839_v19 = vunpack.i.h.bf16 %v837_v17  ;;  %v838_v20 = vunpack.i.l.bf16 %v837_v17  ;;  %v829_v21 = vunpack.i.h.bf16 %v827_v18  ;;  %v828_v22 = vunpack.i.l.bf16 %v827_v18 }
  0xd2   : > { %v236_v29 = vsel %vm235_vm5, %v828_v22, %v829_v21  ;;  %v398_v31 = vsel %vm397_vm6, %v838_v20, %v839_v19 }
  0xd3   : > { %v842_v23 = vpop.permute.xlu1 %841  ;;  %v832_v24 = vpop.permute.xlu0 %831 }
  0xd4   : > { %v844_v25 = vunpack.i.h.bf16 %v842_v23  ;;  %v843_v26 = vunpack.i.l.bf16 %v842_v23  ;;  %v834_v27 = vunpack.i.h.bf16 %v832_v24  ;;  %v833_v28 = vunpack.i.l.bf16 %v832_v24 }
  0xd6   : > { %v237_v30 = vsel %vm235_vm5, %v833_v28, %v834_v27  ;;  %v399_v32 = vsel %vm397_vm6, %v843_v26, %v844_v25 }
  0xd7   : > { %v852_v33 = vpop.permute.xlu1 %851  ;;  %v847_v34 = vpop.permute.xlu0 %846  ;;  %v742_v35 = vpack.c.bf16 %v237_v30, %v236_v29  ;;  %v748_v36 = vpack.c.bf16 %v399_v32, %v398_v31 }
  0xd8   : > { %v854_v37 = vunpack.i.h.bf16 %v852_v33  ;;  %v853_v38 = vunpack.i.l.bf16 %v852_v33  ;;  %v849_v39 = vunpack.i.h.bf16 %v847_v34  ;;  %v848_v40 = vunpack.i.l.bf16 %v847_v34 }
  0xd9   : > { %743 = vmatpush3.bf16.msra.mxu1 %v742_v35  ;;  %749 = vmatpush3.bf16.msra.mxu0 %v748_v36 }
  0xda   : > { %v488_v43 = vsel %vm486_vm7, %v853_v38, %v854_v37  ;;  %v487_v44 = vsel %vm486_vm7, %v848_v40, %v849_v39  ;;  %744 = vmatprep.subr.bf16.mxu1 %v993_v5  ;;  %750 = vmatprep.subr.bf16.mxu0 %v993_v5 }
  0xdb   : > { %v751_v45 = vpack.c.bf16 %v488_v43, %v487_v44 }
  0xdc   : > { %718 = vmatmul.mubr.msk.f32.vlgmr.msra.gmra.mrb[0].mxu1 %vm240_vm8, %v222_v41  ;;  %732 = vmatmul.mubr.msk.f32.vlgmr.msra.gmra.mrb[0].mxu0 %vm240_vm8, %v388_v42 }
  0xdd   : > { %746 = vmatpush3.bf16.msra.mxu1 %v745_v16  ;;  %752 = vmatpush3.bf16.msra.mxu0 %v751_v45 }
  0xde   : > { %724 = vmatprep.mubr.msk.f32.mxu1 %vm996_vm4, %v997_v15  ;;  %738 = vmatprep.mubr.msk.f32.mxu0 %vm996_vm4, %v997_v15 }
  0xe4   : > { %725 = vmatmul.mubr.msk.f32.vlgmr.msra.gmra.mrb[0].mxu1 %vm240_vm8, %v220_v46  ;;  %739 = vmatmul.mubr.msk.f32.vlgmr.msra.gmra.mrb[0].mxu0 %vm240_vm8, %v477_v47 }
 0x1b7   : > { %v383_v48 = vpop.f32.mrb[0].mxu1  ;;  %v560_v49 = vpop.f32.mrb[0].mxu0 }
 0x1b8   : > { %v753_v51 = vadd.f32 %v560_v49, %v383_v48  ;;  %v726_v52 = vpop.f32.mrb[1].mxu1  ;;  %v740_v53 = vpop.f32.mrb[1].mxu0 }
 0x1ba   : > { %v572_v54 = vmul.f32 %v753_v51, %v695_v50 }
 0x1bc   : > { %573 = vadd.xlane.f32.xlu0 %v572_v54 }
 0x249   : > { %v574_v55 = vpop.xlane.xlu0 %573 }
 0x24a   : > { %v575_v56 = vmul.f32 0.015625, %v574_v55 }
 0x24c   : > { %v576_v57 = vsub.f32 %v753_v51, %v575_v56 }
 0x24e   : > { %v577_v58 = vmul.f32 %v695_v50, %v576_v57 }
 0x250   : > { %v578_v59 = vmul.f32 %v577_v58, %v577_v58 }
 0x252   : > { %579 = vadd.xlane.f32.xlu1 %v578_v59 }
 0x2df   : > { %v580_v60 = vpop.xlane.xlu1 %579 }
 0x2e0   : > { %v581_v61 = vmul.f32 0.015625, %v580_v60 }
 0x2e2   : > { %v582_v62 = vadd.f32 1e-05, %v581_v61 }
 0x2e4   : > { %855 = vrsqrt.f32 %v582_v62 }
 0x2ee   : > { %v856_v63 = vpop.eup %855 }
 0x2ef   : > { %v584_v0 = vmul.f32 %v856_v63, %v576_v57 }
 0x2f1   : > { %585 = vst [vmem:[%s203_s11] sm:$0xff] %v584_v0 }
 0x2f2   : > { %928 = shalt.err (!%p925_p7)
}
 0x2f3   : > { %s929_s6 = scalar_lea.hbm %s1191_s23, 128  ;;  %s933_s20 = scalar_lea.hbm %s1238_s3, 256 }
 0x2f4   : > { %p930_p9 = scmp.ne.s32.totalorder %s1191_s23, %s929_s6  ;;  %p934_p5 = scmp.lt.u32.totalorder %s1191_s23, %s1238_s3 }
 0x2f5   : > { %p935_p1 = scmp.lt.u32.totalorder %s933_s20, %s929_s6  ;;  %p937_p4 = scmp.lt.u32.totalorder %s929_s6, %s1191_s23 }
 0x2f6   : > { %p931_p2 = pnand %p930_p9, %p1111_p12 }
 0x2f7   : > { %p936_p11 = por %p935_p1, %p934_p5 }
 0x2f8   : > { %p932_p0 = pneg %p931_p2 }
 0x2f9   : > { %p938_p6 = por %p937_p4, %p936_p11 }
 0x2fb   : > { %p939_p8 = pnand %p938_p6, %p932_p0 }
 0x2fd   : > { %942 = shalt.err (!%p939_p8)
}
 0x2fe   : > { %764 = dma.vmem_to_hbm [thread:$0]  (%p1111_p12), %s1193_s27, 128, %s1191_s23, %s587_s30  }
 0x2ff PF: > { %s612_s26 = sand.u32 1, %s973_s12   ;;  %p1253_p10 = scmp.ne.s32.totalorder %s1243_s19, 0 }
 0x300   : > { %p1254_p13 = scmp.ge.s32.totalorder %s985_s15, 2  ;;  %s613_s5 = scalar_lea.sflag [#allocation4], %s612_s26 }
 0x302   : > { %p775_p3 = pnand %p1254_p13, %p1253_p10 }
 0x304   : > { %968 = dma.done.wait (!%p775_p3), %s613_s5, 128  }
 0x305   : > { %970 = vsyncadd (!%p775_p3), %s613_s5, 4294967168  ;;  %p17_p7 = scmp.ge.s32.totalorder %s1076_s24, 4   ;;  %s1255_s12 = smov %s977_s13 }
 0x306   : > { %s1256_s13 = smov %s981_s14  ;;  %s1257_s14 = smov %s1107_s17 }
 0x307   : > { %s1258_s15 = smov %s1076_s24  ;;  %19 = sbr.rel (!%p17_p7) target bundleno = 6 (0x6), region = 84 }
 0x30e   :  { %618 = vsyncpa [#allocation3], 1 }
 0x30f   :  { %620 = vsyncpa [#allocation3 + $0x1], 1 }
 0x310   :  { %621 = vsyncpa [#allocation6], 1 }
 0x311   :  { %622 = vsyncpa [#allocation4], 1 }
 0x312   :  { %624 = vsyncpa [#allocation4 + $0x1], 1 }

// kernel: tpu_custom_call.1
= control target key start
LH: loop header
LB: loop body
LE: loop exit
PB: predicated region body
PF: predicated region fallthrough
CT: control target
= control target key end

     0   :  { %8 = vsyncpa [#allocation3], 0  ;;  %s1235_s0 = inlined_call_operand.hbm [shape: f32[2,16,138], index: 0, kind: input, shape index: {}]   ;;  %s1236_s1 = inlined_call_operand.hbm [shape: f32[4,8,16], index: 1, kind: input, shape index: {}]   ;;  %s1237_s2 = inlined_call_operand.vmem [shape: f32[1,128], index: 2, kind: input, shape index: {}]   ;;  %s1238_s3 = inlined_call_operand.hbm [shape: f32[2,8,128], index: 3, kind: output, shape index: {}]  }
   0x1   :  { %10 = vsyncpa [#allocation3 + $0x1], 0 }
   0x2   :  { %11 = vsyncpa [#allocation6], 0 }
   0x3   :  { %12 = vsyncpa [#allocation4], 0 }
   0x4   :  { %14 = vsyncpa [#allocation4 + $0x1], 0  ;;  %s1020_s12 = smov 0   ;;  %s1022_s13 = smov 0  }
   0x5   :  { %s1024_s14 = smov 0   ;;  %s1026_s15 = smov 0  }
   0x6 LB: > { %s1041_s16 = sadd.s32 4294967295, %s985_s15   ;;  %s680_s17 = sadd.s32 4294967294, %s985_s15   ;;  %s985_s15 = sphi %s1026_s15, %s1258_s15   ;;  %s981_s14 = sphi %s1024_s14, %s1257_s14   ;;  %s977_s13 = sphi %s1022_s13, %s1256_s13   ;;  %s973_s12 = sphi %s1020_s12, %s1255_s12  }
   0x7   : > { %p40_p0 = scmp.ne.s32.totalorder %s977_s13, %s973_s12  ;;  %p1239_p1 = scmp.eq.s32.totalorder %s1041_s16, 0 }
   0x8   : > { %p112_p3 = scmp.eq.s32.totalorder %s680_s17, 1  ;;  %p681_p5 = scmp.ge.s32.totalorder %s985_s15, 1 }
   0x9   : > { %p1050_p4 = por %p1239_p1, %p40_p0  ;;  %p119_p7 = scmp.lt.s32.totalorder %s985_s15, 3 }
   0xa   : > { %p1055_p6 = por %p112_p3, %p40_p0  ;;  %s987_s21 = smov [#allocation5]  }
   0xb   : > { %s1242_s18 = scalar_select %p1050_p4, 1, 0 }
   0xc   : > { %s1243_s19 = scalar_select %p1055_p6, 1, 0 }
   0xd   : > { %p1060_p8 = pnand %p681_p5, %p119_p7  ;;  %s131_s22 = sshll.u32 %s987_s21, 4  ;;  %s1064_s22 = int_to_ptr.vmem [resolvable:$true] %s131_s22 }
   0xe   : > { %s1076_s24 = sadd.s32 1, %s985_s15   ;;  %s27_s25 = sadd.s32 1, %s981_s14 }
   0xf   : > { %s1244_s20 = scalar_select %p1060_p8, 1, 0 }
  0x10   : > { %p766_p9 = pneg %p1060_p8  ;;  %s24_s26 = ssub.s32 %s985_s15, %s1076_s24 }
  0x11   : > { %s857_s29 = scalar_lea.hbm %s1236_s1, 512 }
  0x12   : > { %p1071_p11 = pnand %p766_p9, %p1239_p1  ;;  %p858_p12 = scmp.ne.s32.totalorder %s1236_s1, %s857_s29 }
  0x13   : > { %p864_p5 = scmp.lt.u32.totalorder %s857_s29, %s1236_s1 }
  0x14   : > { %p859_p13 = pneg %p1071_p11 }
  0x16   : > { %p860_p0 = pnand %p859_p13, %p858_p12 }
  0x18   : > { %p861_p3 = pneg %p860_p0 }
  0x1a   : > { %p866_p7 = pnand %p864_p5, %p861_p3 }
  0x1c   : > { %869 = shalt.err (!%p866_p7)
}
  0x1d   : > { %s870_s7 = scalar_lea.vmem %s1064_s22, 512  ;;  %p878_p2 = scmp.lt.s32.totalorder %s1064_s22, %s1064_s22 }
  0x1e   : > { %p871_p9 = scmp.ne.s32.totalorder %s1064_s22, %s870_s7  ;;  %p879_p6 = scmp.lt.s32.totalorder %s870_s7, %s870_s7 }
  0x20   : > { %p873_p10 = pnand %p871_p9, %p859_p13  ;;  %p880_p4 = por %p879_p6, %p878_p2 }
  0x22   : > { %p874_p1 = pneg %p873_p10 }
  0x24   : > { %p881_p8 = pnand %p880_p4, %p874_p1 }
  0x26   : > { %884 = shalt.err (!%p881_p8)
}
  0x27   : > { %s988_s8 = smov 128   ;;  %s989_s9 = smov 8  }
  0x28   : > { %769 = dma.hbm_to_vmem [thread:$0]  (!%p1071_p11), %s1236_s1, 512, %s1064_s22, [#allocation6], %s988_s8, %s988_s8, %s989_s9  }
  0x29   : > { %p25_p2 = scmp.eq.s32.totalorder %s24_s26, 0  ;;  %p34_p1 = scmp.ne.s32.totalorder %s981_s14, %s977_s13 }
  0x2a   : > { %p35_p4 = scmp.eq.s32.totalorder %s985_s15, 0  ;;  %p779_p6 = scmp.lt.s32.totalorder %s985_s15, 2 }
  0x2b   : > { %s1107_s17 = scalar_select %p25_p2, %s981_s14, %s27_s25  }
  0x2c   : > { %p36_p8 = por %p35_p4, %p34_p1  ;;  %p1246_p10 = scmp.eq.s32.totalorder %s1041_s16, 1 }
  0x2d   : > { %s148_s27 = sand.u32 1, %s981_s14   ;;  %s700_s28 = sshll.u32 %s985_s15, 9 }
  0x2e   : > { %p1111_p12 = por %p1246_p10, %p34_p1  ;;  %s684_s29 = sshll.u32 %s148_s27, 5 }
  0x2f   : > { %s1120_s4 = scalar_lea.hbm %s1235_s0, %s700_s28  ;;  %s152_s22 = scalar_lea.vmem [#allocation2], %s684_s29 }
  0x30   : > { %s159_s25 = sshll.u32 %s152_s22, 4  ;;  %p1122_p11 = pnand %p779_p6, %p36_p8  ;;  %s1126_s25 = int_to_ptr.vmem [resolvable:$true] %s159_s25 }
  0x31   : > { %s1128_s5 = scalar_lea.sflag [#allocation3], %s148_s27  ;;  %s885_s6 = scalar_lea.hbm %s1120_s4, 512 }
  0x32   : > { %p886_p13 = scmp.ne.s32.totalorder %s1120_s4, %s885_s6  ;;  %p887_p0 = pneg %p1122_p11 }
  0x33   : > { %s890_s9 = scalar_lea.hbm %s1235_s0, 1024  ;;  %p891_p7 = scmp.lt.u32.totalorder %s1120_s4, %s1235_s0 }
  0x34   : > { %p888_p3 = pnand %p887_p0, %p886_p13  ;;  %p892_p9 = scmp.lt.u32.totalorder %s890_s9, %s885_s6 }
  0x35   : > { %p894_p1 = scmp.lt.u32.totalorder %s885_s6, %s1120_s4 }
  0x36   : > { %p889_p5 = pneg %p888_p3  ;;  %p893_p2 = por %p892_p9, %p891_p7 }
  0x38   : > { %p895_p4 = por %p894_p1, %p893_p2 }
  0x3a   : > { %p896_p6 = pnand %p895_p4, %p889_p5 }
  0x3c   : > { %899 = shalt.err (!%p896_p6)
}
  0x3d   : > { %s900_s27 = scalar_lea.vmem %s1126_s25, 512  ;;  %s990_s28 = smov [#allocation2]  }
  0x3e   : > { %p901_p8 = scmp.ne.s32.totalorder %s1126_s25, %s900_s27  ;;  %s905_s29 = sshll.u32 %s990_s28, 4  ;;  %s906_s29 = int_to_ptr.vmem [resolvable:$false] %s905_s29 }
  0x3f   : > { %s907_s23 = scalar_lea.vmem %s906_s29, 1024  ;;  %p908_p3 = scmp.lt.s32.totalorder %s1126_s25, %s906_s29 }
  0x40   : > { %p903_p10 = pnand %p901_p8, %p887_p0  ;;  %p909_p7 = scmp.lt.s32.totalorder %s907_s23, %s900_s27 }
  0x42   : > { %p904_p13 = pneg %p903_p10  ;;  %p910_p9 = por %p909_p7, %p908_p3 }
  0x44   : > { %p911_p2 = pnand %p910_p9, %p904_p13 }
  0x46   : > { %914 = shalt.err (!%p911_p2)
}
  0x47   : > { %s991_s30 = smov 256   ;;  %s992_s22 = smov 16  }
  0x48   : > { %773 = dma.hbm_to_vmem [thread:$0]  (!%p1122_p11), %s1120_s4, 512, %s1126_s25, %s1128_s5, %s991_s30, %s991_s30, %s992_s22  }
  0x49   : > { %p1249_p0 = scmp.ne.s32.totalorder %s1244_s20, 0 }
  0x4a   : > { %s1159_s6 = sand.u32 (!%p1249_p0), 1, %s977_s13   ;;  %p1250_p5 = scmp.ne.s32.totalorder (!%p1249_p0), %s1242_s18, 0 }
  0x4b   : > { %171 = sbr.rel (%p1249_p0) target bundleno = 767 (0x2ff), region = 32  ;;  %s688_s7 = sshll.u32 (!%p1249_p0), %s1159_s6, 5 }
  0x4c   : > { %s174_s8 = scalar_lea.sflag (!%p1249_p0), [#allocation3], %s1159_s6  ;;  %s177_s9 = scalar_lea.vmem (!%p1249_p0), [#allocation2], %s688_s7 }
  0x52   : > { %960 = dma.done.wait (%p1250_p5), %s174_s8, 512  }
  0x53   : > { %962 = vsyncadd (%p1250_p5), %s174_s8, 4294966784  ;;  %p1251_p1 = scmp.eq.s32.totalorder %s1041_s16, 0 }
  0x55   : > { %964 = dma.done.wait (%p1251_p1), [#allocation6], 512   ;;  %p1252_p11 = pmov %p1251_p1 }
  0x56   : > { %v204_v0 = vld [vmem:[%s177_s9] sm:$0xff]  ;;  %v205_v1 = vld [vmem:[%s177_s9 + $0x8] sm:$0xff]  ;;  %v206_v2 = vld [vmem:[%s177_s9 + $0x10] sm:$0xff]  ;;  %v993_v5 = vmov 0.0|0.0   ;;  %s994_s18 = smov 119   ;;  %s995_s20 = smov 127  }
  0x57   : > { %966 = vsyncadd (%p1252_p11), [#allocation6], 4294966784  ;;  %vm208_vm0 = vcmp.ge.f32.partialorder %v204_v0, 0.0  ;;  %vm209_vm1 = vcmp.ge.f32.partialorder %v205_v1, 0.0  ;;  %v212_v3 = vmul.f32 0.2, %v204_v0  ;;  %741 = vmatprep.subr.bf16.mxu1 %v993_v5  ;;  %747 = vmatprep.subr.bf16.mxu0 %v993_v5 }
  0x58   : > { %v213_v4 = vmul.f32 0.2, %v205_v1  ;;  %v207_v6 = vld [vmem:[%s177_s9 + $0x18] sm:$0xff]  ;;  %vm210_vm2 = vcmp.ge.f32.partialorder %v206_v2, 0.0  ;;  %v214_v7 = vmul.f32 0.2, %v206_v2 }
  0x59   : > { %v216_v8 = vsel %vm208_vm0, %v204_v0, %v212_v3  ;;  %vm211_vm3 = vcmp.ge.f32.partialorder %v207_v6, 0.0  ;;  %v215_v10 = vmul.f32 0.2, %v207_v6  ;;  %vm996_vm4 = vmmov 0   ;;  %s998_s4 = smov 118   ;;  %v222_v41 = vld [vmem:[#allocation5 + $0x8] sm:$0xff] }
  0x5a   : > { %v217_v9 = vsel %vm209_vm1, %v205_v1, %v213_v4  ;;  %v218_v12 = vsel %vm210_vm2, %v206_v2, %v214_v7  ;;  %v997_v15 = vmov 0.0   ;;  %vm235_vm5 = vcmask 1039360   ;;  %v388_v42 = vld [vmem:[#allocation5 + $0x10] sm:$0xff]  ;;  %v220_v46 = vld [vmem:[#allocation5] sm:$0xff]  ;;  %v477_v47 = vld [vmem:[#allocation5 + $0x18] sm:$0xff]  ;;  %s690_s5 = sshll.u32 %s1159_s6, 3 }
  0x5b   : > { %v835_v11 = vpack.i.bf16 %v217_v9, %v216_v8  ;;  %v219_v13 = vsel %vm211_vm3, %v207_v6, %v215_v10  ;;  %717 = vmatprep.mubr.msk.f32.mxu1 %vm996_vm4, %v997_v15  ;;  %731 = vmatprep.mubr.msk.f32.mxu0 %vm996_vm4, %v997_v15  ;;  %v745_v16 = vpack.c.bf16 %v218_v12, %v216_v8  ;;  %vm397_vm6 = vcmask 973824   ;;  %v695_v50 = vld [vmem:[%s1237_s2] ss:$0 sm:$0xff]  ;;  %s697_s10 = sshll.u32 %s1041_s16, 7  ;;  %s203_s11 = scalar_lea.vmem [#allocation7], %s690_s5 }
  0x5c   : > { %v840_v14 = vpack.i.bf16 %v219_v13, %v218_v12  ;;  %vm486_vm7 = vcmask 965632   ;;  %vm240_vm8 = vcmask 130048   ;;  %s600_s27 = sshll.u32 %s203_s11, 4  ;;  %s1191_s23 = scalar_lea.hbm %s1238_s3, %s697_s10  ;;  %s1193_s27 = int_to_ptr.vmem [resolvable:$true] %s600_s27 }
  0x5d   : > { %836 = vrot.lane.b32.xlu1 %v835_v11, %s994_s18  ;;  %826 = vrot.lane.b32.xlu0 %v835_v11, %s995_s20  ;;  %s587_s30 = scalar_lea.sflag [#allocation4], %s1159_s6  ;;  %s915_s22 = scalar_lea.vmem %s1193_s27, 128 }
  0x5e   : > { %p916_p4 = scmp.ne.s32.totalorder %s1193_s27, %s915_s22  ;;  %s999_s16 = smov [#allocation7]  }
  0x5f   : > { %s919_s7 = sshll.u32 %s999_s16, 4  ;;  %s920_s7 = int_to_ptr.vmem [resolvable:$false] %s919_s7 }
  0x60   : > { %p917_p6 = pnand %p916_p4, %p1111_p12  ;;  %s921_s8 = scalar_lea.vmem %s920_s7, 256 }
  0x61   : > { %841 = vrot.lane.b32.xlu1 %v840_v14, %s994_s18  ;;  %831 = vrot.lane.b32.xlu0 %v840_v14, %s995_s20  ;;  %p922_p10 = scmp.lt.s32.totalorder %s1193_s27, %s920_s7  ;;  %p923_p13 = scmp.lt.s32.totalorder %s921_s8, %s915_s22 }
  0x62   : > { %p918_p8 = pneg %p917_p6 }
  0x63   : > { %p924_p3 = por %p923_p13, %p922_p10 }
  0x65   : > { %851 = vrot.lane.b32.xlu1 %v840_v14, %s998_s4  ;;  %846 = vrot.lane.b32.xlu0 %v835_v11, %s998_s4  ;;  %p925_p7 = pnand %p924_p3, %p918_p8 }
  0xcf   : > { %v837_v17 = vpop.permute.xlu1 %836  ;;  %v827_v18 = vpop.permute.xlu0 %826 }
  0xd0   : > { %v839_v19 = vunpack.i.h.bf16 %v837_v17  ;;  %v838_v20 = vunpack.i.l.bf16 %v837_v17  ;;  %v829_v21 = vunpack.i.h.bf16 %v827_v18  ;;  %v828_v22 = vunpack.i.l.bf16 %v827_v18 }
  0xd2   : > { %v236_v29 = vsel %vm235_vm5, %v828_v22, %v829_v21  ;;  %v398_v31 = vsel %vm397_vm6, %v838_v20, %v839_v19 }
  0xd3   : > { %v842_v23 = vpop.permute.xlu1 %841  ;;  %v832_v24 = vpop.permute.xlu0 %831 }
  0xd4   : > { %v844_v25 = vunpack.i.h.bf16 %v842_v23  ;;  %v843_v26 = vunpack.i.l.bf16 %v842_v23  ;;  %v834_v27 = vunpack.i.h.bf16 %v832_v24  ;;  %v833_v28 = vunpack.i.l.bf16 %v832_v24 }
  0xd6   : > { %v237_v30 = vsel %vm235_vm5, %v833_v28, %v834_v27  ;;  %v399_v32 = vsel %vm397_vm6, %v843_v26, %v844_v25 }
  0xd7   : > { %v852_v33 = vpop.permute.xlu1 %851  ;;  %v847_v34 = vpop.permute.xlu0 %846  ;;  %v742_v35 = vpack.c.bf16 %v237_v30, %v236_v29  ;;  %v748_v36 = vpack.c.bf16 %v399_v32, %v398_v31 }
  0xd8   : > { %v854_v37 = vunpack.i.h.bf16 %v852_v33  ;;  %v853_v38 = vunpack.i.l.bf16 %v852_v33  ;;  %v849_v39 = vunpack.i.h.bf16 %v847_v34  ;;  %v848_v40 = vunpack.i.l.bf16 %v847_v34 }
  0xd9   : > { %743 = vmatpush3.bf16.msra.mxu1 %v742_v35  ;;  %749 = vmatpush3.bf16.msra.mxu0 %v748_v36 }
  0xda   : > { %v488_v43 = vsel %vm486_vm7, %v853_v38, %v854_v37  ;;  %v487_v44 = vsel %vm486_vm7, %v848_v40, %v849_v39  ;;  %744 = vmatprep.subr.bf16.mxu1 %v993_v5  ;;  %750 = vmatprep.subr.bf16.mxu0 %v993_v5 }
  0xdb   : > { %v751_v45 = vpack.c.bf16 %v488_v43, %v487_v44 }
  0xdc   : > { %718 = vmatmul.mubr.msk.f32.vlgmr.msra.gmra.mrb[0].mxu1 %vm240_vm8, %v222_v41  ;;  %732 = vmatmul.mubr.msk.f32.vlgmr.msra.gmra.mrb[0].mxu0 %vm240_vm8, %v388_v42 }
  0xdd   : > { %746 = vmatpush3.bf16.msra.mxu1 %v745_v16  ;;  %752 = vmatpush3.bf16.msra.mxu0 %v751_v45 }
  0xde   : > { %724 = vmatprep.mubr.msk.f32.mxu1 %vm996_vm4, %v997_v15  ;;  %738 = vmatprep.mubr.msk.f32.mxu0 %vm996_vm4, %v997_v15 }
  0xe4   : > { %725 = vmatmul.mubr.msk.f32.vlgmr.msra.gmra.mrb[0].mxu1 %vm240_vm8, %v220_v46  ;;  %739 = vmatmul.mubr.msk.f32.vlgmr.msra.gmra.mrb[0].mxu0 %vm240_vm8, %v477_v47 }
 0x1b7   : > { %v383_v48 = vpop.f32.mrb[0].mxu1  ;;  %v560_v49 = vpop.f32.mrb[0].mxu0 }
 0x1b8   : > { %v753_v51 = vadd.f32 %v560_v49, %v383_v48  ;;  %v726_v52 = vpop.f32.mrb[1].mxu1  ;;  %v740_v53 = vpop.f32.mrb[1].mxu0 }
 0x1ba   : > { %v572_v54 = vmul.f32 %v753_v51, %v695_v50 }
 0x1bc   : > { %573 = vadd.xlane.f32.xlu0 %v572_v54 }
 0x249   : > { %v574_v55 = vpop.xlane.xlu0 %573 }
 0x24a   : > { %v575_v56 = vmul.f32 0.015625, %v574_v55 }
 0x24c   : > { %v576_v57 = vsub.f32 %v753_v51, %v575_v56 }
 0x24e   : > { %v577_v58 = vmul.f32 %v695_v50, %v576_v57 }
 0x250   : > { %v578_v59 = vmul.f32 %v577_v58, %v577_v58 }
 0x252   : > { %579 = vadd.xlane.f32.xlu1 %v578_v59 }
 0x2df   : > { %v580_v60 = vpop.xlane.xlu1 %579 }
 0x2e0   : > { %v581_v61 = vmul.f32 0.015625, %v580_v60 }
 0x2e2   : > { %v582_v62 = vadd.f32 1e-05, %v581_v61 }
 0x2e4   : > { %855 = vrsqrt.f32 %v582_v62 }
 0x2ee   : > { %v856_v63 = vpop.eup %855 }
 0x2ef   : > { %v584_v0 = vmul.f32 %v856_v63, %v576_v57 }
 0x2f1   : > { %585 = vst [vmem:[%s203_s11] sm:$0xff] %v584_v0 }
 0x2f2   : > { %928 = shalt.err (!%p925_p7)
}
 0x2f3   : > { %s929_s6 = scalar_lea.hbm %s1191_s23, 128  ;;  %s933_s20 = scalar_lea.hbm %s1238_s3, 256 }
 0x2f4   : > { %p930_p9 = scmp.ne.s32.totalorder %s1191_s23, %s929_s6  ;;  %p934_p5 = scmp.lt.u32.totalorder %s1191_s23, %s1238_s3 }
 0x2f5   : > { %p935_p1 = scmp.lt.u32.totalorder %s933_s20, %s929_s6  ;;  %p937_p4 = scmp.lt.u32.totalorder %s929_s6, %s1191_s23 }
 0x2f6   : > { %p931_p2 = pnand %p930_p9, %p1111_p12 }
 0x2f7   : > { %p936_p11 = por %p935_p1, %p934_p5 }
 0x2f8   : > { %p932_p0 = pneg %p931_p2 }
 0x2f9   : > { %p938_p6 = por %p937_p4, %p936_p11 }
 0x2fb   : > { %p939_p8 = pnand %p938_p6, %p932_p0 }
 0x2fd   : > { %942 = shalt.err (!%p939_p8)
}
 0x2fe   : > { %764 = dma.vmem_to_hbm [thread:$0]  (%p1111_p12), %s1193_s27, 128, %s1191_s23, %s587_s30  }
 0x2ff PF: > { %s612_s26 = sand.u32 1, %s973_s12   ;;  %p1253_p10 = scmp.ne.s32.totalorder %s1243_s19, 0 }
 0x300   : > { %p1254_p13 = scmp.ge.s32.totalorder %s985_s15, 2  ;;  %s613_s5 = scalar_lea.sflag [#allocation4], %s612_s26 }
 0x302   : > { %p775_p3 = pnand %p1254_p13, %p1253_p10 }
 0x304   : > { %968 = dma.done.wait (!%p775_p3), %s613_s5, 128  }
 0x305   : > { %970 = vsyncadd (!%p775_p3), %s613_s5, 4294967168  ;;  %p17_p7 = scmp.ge.s32.totalorder %s1076_s24, 4   ;;  %s1255_s12 = smov %s977_s13 }
 0x306   : > { %s1256_s13 = smov %s981_s14  ;;  %s1257_s14 = smov %s1107_s17 }
 0x307   : > { %s1258_s15 = smov %s1076_s24  ;;  %19 = sbr.rel (!%p17_p7) target bundleno = 6 (0x6), region = 84 }
 0x30e   :  { %618 = vsyncpa [#allocation3], 1 }
 0x30f   :  { %620 = vsyncpa [#allocation3 + $0x1], 1 }
 0x310   :  { %621 = vsyncpa [#allocation6], 1 }
 0x311   :  { %622 = vsyncpa [#allocation4], 1 }
 0x312   :  { %624 = vsyncpa [#allocation4 + $0x1], 1 }

</bundles_post_ra>
